<compile_context>
chip_gen: v7x
topology: tpu7x:2x2x1
jax: 0.10.0
libtpu: 0.0.40
codegen_flags: <defaults>
</compile_context>

<pallas_src>
import functools

import jax
import jax.numpy as jnp
from jax.experimental import pallas as pl
from jax.experimental.pallas import tpu as pltpu


def _rmsnorm_kernel(x_ref, w_ref, o_ref, *, eps):
    # f32 statistics (matches hidden_states.to(torch.float32)).  The upcast is
    # consumed immediately by the reduction; the normalize below re-reads the
    # native-dtype VMEM buffer, so no full f32 copy of the block has to stay
    # live across both uses.
    var = jnp.mean(jnp.square(x_ref[...].astype(jnp.float32)),
                   axis=-1, keepdims=True)              # cross-lane reduce -> XLU
    inv = jax.lax.rsqrt(var + eps)                      # rsqrt -> EUP
    normed = (x_ref[...].astype(jnp.float32) * inv).astype(x_ref.dtype)
    # HF: self.weight * hidden_states.to(input_dtype); jnp promotes dtypes the
    # same way torch does (weight dtype x input dtype -> o_ref.dtype).
    o_ref[...] = (w_ref[...] * normed).astype(o_ref.dtype)


def _tpu_vmem_and_cores():
    """(physical VMEM bytes per TensorCore, TensorCores per chip).

    Defensive: falls back to v7x-safe values (64 MiB, 1 core) if the
    trace-time hardware query is unavailable."""
    vmem = 64 << 20
    cores = 1
    try:
        info = pltpu.get_tpu_info()
        vmem = int(getattr(info, "vmem_capacity_bytes", vmem) or vmem)
        for attr in ("num_cores", "tensorcores_per_chip", "num_tensorcores"):
            v = getattr(info, attr, None)
            if v:
                cores = int(v)
                break
    except Exception:
        pass
    return vmem, cores


def _sublane_packing(itemsize):
    # 8 rows for 4-byte dtypes, 16 for bf16/fp16, 32 for int8/fp8.
    return 8 * max(1, 4 // max(1, itemsize))


def _choose_block_rows(rows, hidden, in_item, out_item, vmem_budget, min_steps):
    """Largest row-tile that (a) respects the dtype's sublane packing,
    (b) keeps the double-buffered pipeline inside the chip-derived VMEM budget,
    and (c) keeps enough grid steps to pipeline / shard across TensorCores."""
    packing = _sublane_packing(in_item)
    # Per-row pipeline cost: 2x input + 2x output buffers (native dtypes) plus
    # ~1 f32 temporary live inside the kernel body.
    bytes_per_row = hidden * (2 * in_item + 2 * out_item + 4)
    block = max(packing, vmem_budget // max(1, bytes_per_row))
    block = min(block, 2048)
    rows_padded = -(-rows // packing) * packing
    block = min(block, rows_padded)
    # Keep >= min_steps grid steps (8 on multi-TC v7x, 2 on single-TC v5e/v6e),
    # but never shrink below ~256 rows (tiny tiles fall off the HBM roofline).
    while -(-rows // block) < min_steps and block > max(256, packing):
        block //= 2
    block = max(packing, (block // packing) * packing)
    return block


def llama_rmsnorm(hidden_states, weight, eps=1e-6, *, block_rows=None):
    """hidden_states: (..., hidden_size); weight: (hidden_size,)."""
    orig_shape = hidden_states.shape
    hidden = orig_shape[-1]
    x2d = hidden_states.reshape(-1, hidden)
    rows = x2d.shape[0]

    in_item = jnp.dtype(hidden_states.dtype).itemsize
    # Output dtype follows torch promotion of (weight.dtype, input_dtype),
    # matching `self.weight * hidden_states.to(input_dtype)`.
    out_dtype = jnp.promote_types(hidden_states.dtype, weight.dtype)
    out_item = jnp.dtype(out_dtype).itemsize
    w_item = jnp.dtype(weight.dtype).itemsize

    phys_vmem, cores = _tpu_vmem_and_cores()
    vmem_budget = phys_vmem // 2          # ~64 MiB on v5e/v6e, ~32 MiB on v7x
    vmem_cap = (phys_vmem * 3) // 4       # never ask Mosaic for >75% of VMEM

    packing = _sublane_packing(in_item)
    bytes_per_row = hidden * (2 * in_item + 2 * out_item + 4)
    min_steps = 8 if cores >= 2 else 2

    if block_rows is None:
        block_rows = _choose_block_rows(rows, hidden, in_item, out_item,
                                        vmem_budget, min_steps)
    else:
        # Clamp a user-supplied tile so the pipeline buffers stay inside the
        # per-TensorCore budget (e.g. 1024 rows x 8192 hidden bf16 would blow
        # v7x's 64 MiB/TC).
        max_rows = max(packing, vmem_budget // max(1, bytes_per_row))
        block_rows = max(packing, min(int(block_rows), max_rows))
        block_rows = max(packing, (block_rows // packing) * packing)

    # Weight stays in its own dtype; promotion happens inside the kernel.
    w2d = weight.reshape(1, hidden)

    # cdiv grid: the last (partial) block's out-of-bounds rows are read as
    # padding and their writes are masked; per-row math keeps the garbage rows
    # from contaminating valid rows, so no divisibility assert is needed.
    grid = (pl.cdiv(rows, block_rows),)

    # Double-buffered in + out blocks, the weight row, f32 temps, + headroom.
    vmem_limit = (block_rows * hidden * (2 * in_item + 2 * out_item)
                  + 2 * block_rows * hidden * 4
                  + 2 * hidden * w_item
                  + (2 << 20))
    vmem_limit = int(min(max(vmem_limit, 16 << 20), vmem_cap))

    kernel = functools.partial(_rmsnorm_kernel, eps=eps)

    out = pl.pallas_call(
        kernel,
        out_shape=jax.ShapeDtypeStruct((rows, hidden), out_dtype),
        grid_spec=pltpu.PrefetchScalarGridSpec(
            num_scalar_prefetch=0,
            grid=grid,
            in_specs=[
                pl.BlockSpec((block_rows, hidden), lambda i: (i, 0)),
                pl.BlockSpec((1, hidden), lambda i: (0, 0)),
            ],
            out_specs=pl.BlockSpec((block_rows, hidden), lambda i: (i, 0)),
        ),
        compiler_params=pltpu.CompilerParams(
            dimension_semantics=("parallel",),
            vmem_limit_bytes=vmem_limit,
        ),
    )(x2d, w2d)

    return out.reshape(orig_shape)


def _reference(x, weight, eps):
    xf = x.astype(jnp.float32)
    var = jnp.mean(xf * xf, axis=-1, keepdims=True)
    normed = (xf * jax.lax.rsqrt(var + eps)).astype(x.dtype)
    return weight * normed   # jnp promotion mirrors torch promotion


if __name__ == "__main__":
    eps = 1e-6
    key = jax.random.PRNGKey(0)
    k1, k2, k3, k4 = jax.random.split(key, 4)

    # Case 1: small f32 input, shapes consistent with (batch, seq, hidden).
    batch, seq, hidden = 2, 8, 256
    x = jax.random.normal(k1, (batch, seq, hidden), dtype=jnp.float32)
    weight = (1.0 + 0.05 * jax.random.normal(k2, (hidden,))).astype(jnp.float32)
    out = jax.block_until_ready(llama_rmsnorm(x, weight, eps=eps))
    ref = _reference(x, weight, eps)
    assert out.shape == x.shape and out.dtype == x.dtype
    assert jnp.allclose(out, ref, atol=1e-5, rtol=1e-5)

    # Case 2: bf16 with a row count that does NOT divide the block size
    # (exercises the cdiv / masked-tail path and dtype-aware sublane packing).
    b2, s2, h2 = 3, 5, 256
    x2 = jax.random.normal(k3, (b2, s2, h2), dtype=jnp.bfloat16)
    w2 = jnp.ones((h2,), dtype=jnp.bfloat16)
    out2 = jax.block_until_ready(llama_rmsnorm(x2, w2, eps=eps))
    ref2 = _reference(x2, w2, eps)
    assert out2.shape == x2.shape and out2.dtype == x2.dtype
    assert jnp.allclose(out2.astype(jnp.float32), ref2.astype(jnp.float32),
                        atol=2e-2, rtol=2e-2)

    # Case 3: mixed dtypes (f32 weight x bf16 activations) -> torch promotion
    # gives an f32 output; the kernel must match HF here.
    x3 = jax.random.normal(k4, (2, 7, 256), dtype=jnp.bfloat16)
    w3 = (1.0 + 0.05 * jax.random.normal(k2, (256,))).astype(jnp.float32)
    out3 = jax.block_until_ready(llama_rmsnorm(x3, w3, eps=eps))
    ref3 = _reference(x3, w3, eps)
    assert out3.shape == x3.shape and out3.dtype == jnp.float32
    assert jnp.allclose(out3, ref3, atol=2e-2, rtol=2e-2)

    print("KERNEL_OK")
</pallas_src>

<mosaic_0001>
module attributes {stable_mosaic.version = 11 : i64} {
  func.func @_rmsnorm_kernel(%arg0: i32, %arg1: memref<16x256xf32, #tpu.memory_space<vmem>>, %arg2: memref<1x256xf32, #tpu.memory_space<vmem>>, %arg3: memref<16x256xf32, #tpu.memory_space<vmem>>) attributes {dimension_semantics = [#tpu.dimension_semantics<parallel>], iteration_bounds = array<i64: 1>, scalar_prefetch = 0 : i64, scratch_operands = 0 : i64, tpu.core_type = #tpu.core_type<tc>, window_params = [{transform_indices = @transform_0, window_bounds = array<i64: 16, 256>}, {pipeline_mode = #tpu.pipeline_mode<synchronous>, transform_indices = @transform_1, window_bounds = array<i64: 1, 256>}, {transform_indices = @transform_2, window_bounds = array<i64: 16, 256>}]} {
    %c0 = arith.constant 0 : index
    %c0_0 = arith.constant 0 : index
    %0 = vector.load %arg1[%c0, %c0_0] : memref<16x256xf32, #tpu.memory_space<vmem>>, vector<16x256xf32>
    %1 = arith.mulf %0, %0 : vector<16x256xf32>
    %cst = arith.constant dense<0.000000e+00> : vector<16xf32>
    %2 = vector.multi_reduction <add>, %1, %cst [1] : vector<16x256xf32> to vector<16xf32>
    %3 = vector.shape_cast %2 : vector<16xf32> to vector<16x1xf32>
    %cst_1 = arith.constant 2.560000e+02 : f32
    %4 = vector.broadcast %cst_1 : f32 to vector<16x1xf32>
    %5 = arith.divf %3, %4 : vector<16x1xf32>
    %cst_2 = arith.constant 9.99999997E-7 : f32
    %6 = vector.broadcast %cst_2 : f32 to vector<16x1xf32>
    %7 = arith.addf %5, %6 : vector<16x1xf32>
    %8 = math.rsqrt %7 : vector<16x1xf32>
    %c0_3 = arith.constant 0 : index
    %c0_4 = arith.constant 0 : index
    %9 = vector.load %arg1[%c0_3, %c0_4] : memref<16x256xf32, #tpu.memory_space<vmem>>, vector<16x256xf32>
    %10 = vector.broadcast %8 : vector<16x1xf32> to vector<16x256xf32>
    %11 = arith.mulf %9, %10 : vector<16x256xf32>
    %c0_5 = arith.constant 0 : index
    %c0_6 = arith.constant 0 : index
    %12 = vector.load %arg2[%c0_5, %c0_6] : memref<1x256xf32, #tpu.memory_space<vmem>>, vector<1x256xf32>
    %13 = vector.broadcast %12 : vector<1x256xf32> to vector<16x256xf32>
    %14 = arith.mulf %13, %11 : vector<16x256xf32>
    %c0_7 = arith.constant 0 : index
    %c0_8 = arith.constant 0 : index
    %15 = vector.load %arg3[%c0_7, %c0_8] : memref<16x256xf32, #tpu.memory_space<vmem>>, vector<16x256xf32>
    tpu.vector_store %arg3[%c0_7, %c0_8], %14 {strides = array<i32>} : memref<16x256xf32, #tpu.memory_space<vmem>>, vector<16x256xf32>,
    return
  }
  func.func @transform_0(%arg0: i32) -> (i32, i32) {
    %c0_i32 = arith.constant 0 : i32
    %c0_i32_0 = arith.constant 0 : i32
    return %arg0, %c0_i32 : i32, i32
  }
  func.func @transform_1(%arg0: i32) -> (i32, i32) {
    %c0_i32 = arith.constant 0 : i32
    %c0_i32_0 = arith.constant 0 : i32
    %c0_i32_1 = arith.constant 0 : i32
    return %c0_i32, %c0_i32_0 : i32, i32
  }
  func.func @transform_2(%arg0: i32) -> (i32, i32) {
    %c0_i32 = arith.constant 0 : i32
    %c0_i32_0 = arith.constant 0 : i32
    return %arg0, %c0_i32 : i32, i32
  }
}

</mosaic_0001>

<bundles_post_ra>
// kernel: tpu_custom_call.1
= control target key start
LH: loop header
LB: loop body
LE: loop exit
PB: predicated region body
PF: predicated region fallthrough
CT: control target
= control target key end

     0   :  { %7 = vsyncpa [#allocation3], 0  ;;  %s196_s0 = inlined_call_operand.hbm [shape: f32[16,256], index: 0, kind: input, shape index: {}]   ;;  %s197_s1 = inlined_call_operand.vmem [shape: f32[1,256], index: 1, kind: input, shape index: {}]   ;;  %s198_s2 = inlined_call_operand.hbm [shape: f32[16,256], index: 2, kind: output, shape index: {}]  }
   0x1   :  { %8 = vsyncpa [#allocation4], 0  ;;  %s144_s9 = smov [#allocation2]   ;;  %s96_s13 = scalar_lea.hbm %s196_s0, 512 }
   0x2   :  { %s14_s10 = sshll.u32 %s144_s9, 4  ;;  %p97_p0 = scmp.ne.s32.totalorder %s196_s0, %s96_s13  ;;  %s15_s10 = int_to_ptr.vmem [resolvable:$true] %s14_s10 }
   0x3   :  { %p100_p1 = scmp.lt.u32.totalorder %s96_s13, %s196_s0 }
   0x5   :  { %p102_p2 = pnand %p100_p1, %p97_p0 }
   0x7   :  { %105 = shalt.err (!%p102_p2)
}
   0x8   :  { %s106_s18 = scalar_lea.vmem %s15_s10, 512  ;;  %p111_p4 = scmp.lt.s32.totalorder %s15_s10, %s15_s10 }
   0x9   :  { %p107_p3 = scmp.ne.s32.totalorder %s15_s10, %s106_s18  ;;  %p112_p5 = scmp.lt.s32.totalorder %s106_s18, %s106_s18 }
   0xb   :  { %p113_p6 = por %p112_p5, %p111_p4 }
   0xd   :  { %p114_p7 = pnand %p113_p6, %p107_p3 }
   0xf   :  { %117 = shalt.err (!%p114_p7)
}
  0x10   :  { %s145_s19 = smov 256   ;;  %s146_s20 = smov 16  }
  0x11   :  { %20 = dma.hbm_to_vmem [thread:$0]  %s196_s0, 512, %s15_s10, [#allocation3], %s145_s19, %s145_s19, %s146_s20  }
  0x12   :  { %140 = dma.done.wait [#allocation3], 512  }
  0x13   :  { %141 = vsyncadd [#allocation3], 4294966784  ;;  %v26_v0 = vld [vmem:[#allocation2] sm:$0xff]  ;;  %v27_v1 = vld [vmem:[#allocation2 + $0x8] sm:$0xff]  ;;  %v53_v12 = vlaneseq  ;;  %s147_s24 = smov [#allocation5]  }
  0x14   :  { %v28_v2 = vld [vmem:[#allocation2 + $0x10] sm:$0xff]  ;;  %v30_v3 = vmul.f32 %v26_v0, %v26_v0  ;;  %v31_v4 = vmul.f32 %v27_v1, %v27_v1  ;;  %v29_v5 = vld [vmem:[#allocation2 + $0x18] sm:$0xff]  ;;  %v51_v20 = vld [vmem:[%s197_s1] sm:$0x3]  ;;  %s76_s25 = sshll.u32 %s147_s24, 4  ;;  %s77_s25 = int_to_ptr.vmem [resolvable:$true] %s76_s25 }
  0x15   :  { %v32_v6 = vmul.f32 %v28_v2, %v28_v2  ;;  %v33_v7 = vmul.f32 %v29_v5, %v29_v5  ;;  %v54_v16 = vshrl.u32 %v53_v12, 7  ;;  %s118_s1 = scalar_lea.vmem %s77_s25, 512  ;;  %p123_p9 = scmp.lt.s32.totalorder %s77_s25, %s77_s25 }
  0x16   :  { %v34_v8 = vadd.f32 %v31_v4, %v30_v3  ;;  %p119_p8 = scmp.ne.s32.totalorder %s77_s25, %s118_s1  ;;  %p124_p10 = scmp.lt.s32.totalorder %s118_s1, %s118_s1 }
  0x17   :  { %v37_v9 = vadd.f32 %v33_v7, %v32_v6  ;;  %v55_v18 = vsub.s32 0, %v54_v16  ;;  %v59_v19 = vsub.s32 1, %v54_v16 }
  0x18   :  { %35 = vadd.xlane.f32.xlu0 %v34_v8  ;;  %p125_p11 = por %p124_p10, %p123_p9 }
  0x19   :  { %v56_v21 = vrot.slane %v51_v20, %v55_v18  ;;  %v60_v22 = vrot.slane %v51_v20, %v59_v19 }
  0x1a   :  { %p126_p12 = pnand %p125_p11, %p119_p8 }
  0x1c   :  { %38 = vadd.xlane.f32.xlu0 %v37_v9 }
  0xa5   :  { %v36_v10 = vpop.xlane.xlu0 %35 }
  0xa6   :  { %v41_v11 = vmul.f32 0.00390625, %v36_v10 }
  0xa8   :  { %v43_v13 = vadd.f32 1e-06, %v41_v11 }
  0xa9   :  { %v39_v14 = vpop.xlane.xlu0 %38 }
  0xaa   :  { %92 = vrsqrt.f32 %v43_v13  ;;  %v42_v15 = vmul.f32 0.00390625, %v39_v14 }
  0xac   :  { %v44_v17 = vadd.f32 1e-06, %v42_v15 }
  0xae   :  { %94 = vrsqrt.f32 %v44_v17 }
  0xb4   :  { %v93_v23 = vpop.eup %92 }
  0xb5   :  { %v47_v24 = vmul.f32 %v93_v23, %v26_v0  ;;  %v48_v25 = vmul.f32 %v93_v23, %v27_v1 }
  0xb7   :  { %v63_v26 = vmul.f32 %v56_v21, %v47_v24  ;;  %v64_v27 = vmul.f32 %v60_v22, %v48_v25 }
  0xb8   :  { %v95_v28 = vpop.eup %94 }
  0xb9   :  { %v49_v29 = vmul.f32 %v95_v28, %v28_v2  ;;  %v50_v30 = vmul.f32 %v95_v28, %v29_v5  ;;  %67 = vst [vmem:[#allocation5] sm:$0xff] %v63_v26  ;;  %68 = vst [vmem:[#allocation5 + $0x8] sm:$0xff] %v64_v27 }
  0xbb   :  { %v65_v31 = vmul.f32 %v56_v21, %v49_v29  ;;  %v66_v32 = vmul.f32 %v60_v22, %v50_v30 }
  0xbd   :  { %69 = vst [vmem:[#allocation5 + $0x10] sm:$0xff] %v65_v31  ;;  %70 = vst [vmem:[#allocation5 + $0x18] sm:$0xff] %v66_v32 }
  0xbe   :  { %129 = shalt.err (!%p126_p12)
}
  0xbf   :  { %s130_s28 = scalar_lea.hbm %s198_s2, 512 }
  0xc0   :  { %p131_p13 = scmp.ne.s32.totalorder %s198_s2, %s130_s28  ;;  %p134_p0 = scmp.lt.u32.totalorder %s130_s28, %s198_s2 }
  0xc2   :  { %p136_p1 = pnand %p134_p0, %p131_p13 }
  0xc4   :  { %139 = shalt.err (!%p136_p1)
}
  0xc5   :  { %82 = dma.vmem_to_hbm [thread:$0]  %s77_s25, 512, %s198_s2, [#allocation4], %s145_s19, %s145_s19, %s146_s20  }
  0xc6   :  { %142 = dma.done.wait [#allocation4], 512  }
  0xc7   :  { %143 = vsyncadd [#allocation4], 4294966784 }
  0xc8   :  { %86 = vsyncpa [#allocation3], 1 }
  0xc9   :  { %87 = vsyncpa [#allocation4], 1 }

</bundles_post_ra>
